<compile_context>
chip_gen: v7x
topology: tpu7x:2x2x1
jax: 0.10.0
libtpu: 0.0.40
codegen_flags: <defaults>
</compile_context>

<pallas_src>
import functools

import jax
import jax.numpy as jnp
from jax.experimental import pallas as pl
from jax.experimental.pallas import tpu as pltpu


def attention_kernel(x_ref, w_ref, bias_ref, o_ref, *, heads):
    """Fused attention over one (batch_block, N, D) tile.

    x_ref    : (bb, N, D)  compute dtype (bf16)
    w_ref    : (D, 4*D)    packed [ Wq*scale | Wk | Wv | Wout ], compute dtype
    bias_ref : (1, D)      f32 output bias
    o_ref    : (bb, N, D)  output dtype
    """
    xb = x_ref[...]                                   # (bb, n, dim)
    bb, n, dim = xb.shape
    d = dim // heads
    rows = bb * n
    g = bb * heads

    w = w_ref[...]                                    # (dim, 4*dim), one aligned load

    # ---- fused QKV projection: single lane-dense matmul, f32 accumulate ----
    xf = xb.reshape(rows, dim)                        # merge (bb, n) -> rows
    qkv = jnp.dot(xf, w[:, :3 * dim],
                  preferred_element_type=jnp.float32)  # (rows, 3*dim) f32

    # ---- split heads out of the lane dim (static slices + leading concat) ----
    def split_heads(part):
        chunks = []
        for h in range(heads):
            c0 = part * dim + h * d
            chunks.append(qkv[:, c0:c0 + d].reshape(1, bb, n, d))
        t = jnp.concatenate(chunks, axis=0)           # (heads, bb, n, d)
        return t.reshape(g, n, d)                     # group index = h*bb + b

    q = split_heads(0).astype(xb.dtype)   # softmax scale pre-folded into Wq
    k = split_heads(1).astype(xb.dtype)
    v = split_heads(2).astype(xb.dtype)

    # ---- scores + numerically-stable softmax (f32 math, bf16 MXU operands) ----
    s = jnp.einsum("gnd,gmd->gnm", q, k,
                   preferred_element_type=jnp.float32)          # (g, n, n) f32
    s = s - jnp.max(s, axis=-1, keepdims=True)
    p = jnp.exp(s)
    denom = jnp.sum(p, axis=-1, keepdims=True)                  # (g, n, 1)

    acc = jnp.einsum("gnm,gmd->gnd", p.astype(xb.dtype), v,
                     preferred_element_type=jnp.float32)        # (g, n, d) f32
    acc = acc * pl.reciprocal(denom, approx=True)               # EUP, ~free

    # ---- merge heads back into lanes: (g, n, d) -> (rows, dim) ----
    acc4 = acc.reshape(heads, bb, n, d)
    cols = [acc4[h].reshape(rows, d) for h in range(heads)]
    accf = jnp.concatenate(cols, axis=-1).astype(xb.dtype)      # (rows, dim)

    # ---- fused output projection: single matmul + bias (added once) ----
    out = jnp.dot(accf, w[:, 3 * dim:],
                  preferred_element_type=jnp.float32)           # (rows, dim) f32
    out = out + bias_ref[...]
    o_ref[...] = out.reshape(bb, n, dim).astype(o_ref.dtype)


def prepare_params(w_qkv, w_out, b_out, *, heads, compute_dtype=jnp.bfloat16):
    """One-time parameter packing — call at init, NOT per forward call.

    Packs [ Wq * 1/sqrt(d) | Wk | Wv | Wout ] into one lane-dense (D, 4D)
    slab (so the kernel takes 3 refs instead of 7) and folds the softmax
    scale into the small, reused Q weights.
    """
    D = w_out.shape[0]
    assert D % heads == 0, "dim must be divisible by heads"
    d = D // heads
    assert w_qkv.shape == (D, 3 * D)
    assert w_out.shape == (D, D)
    assert b_out.shape == (D,)
    scale = 1.0 / (d ** 0.5)
    w_slab = jnp.concatenate(
        [w_qkv[:, :D] * scale, w_qkv[:, D:], w_out], axis=1
    ).astype(compute_dtype)                                     # (D, 4D)
    bias = b_out.reshape(1, D).astype(jnp.float32)
    return w_slab, bias


def _tensorcores_per_device():
    """Best-effort TensorCore-per-device count (perf heuristic only)."""
    try:
        info = pltpu.get_tpu_info()
        for name in ("num_cores", "core_count", "num_tensorcores",
                     "tensor_core_count", "cores_per_chip"):
            val = getattr(info, name, None)
            if isinstance(val, int) and val > 0:
                return val
    except Exception:
        pass
    try:
        kind = jax.devices()[0].device_kind.lower()
        # v4 / v5p (megacore) and v7x expose 2 TensorCores per device.
        if any(tag in kind for tag in ("v4", "v5p", "7")):
            return 2
    except Exception:
        pass
    return 1


@functools.partial(jax.jit,
                   static_argnames=("heads", "batch_block", "compute_dtype"))
def attention(x, w_slab, bias, *, heads, batch_block=None,
              compute_dtype=jnp.bfloat16):
    """x: (B, N, D); w_slab: (D, 4D) packed weights; bias: (1, D) f32."""
    B, N, D = x.shape
    assert w_slab.shape == (D, 4 * D)
    assert bias.shape == (1, D)

    if batch_block is None:
        # Multi-TC devices (v7x / megacore): grid=(B,) + "parallel" so the
        # cores split the batch.  Single-TC chips (v5e / v6e): collapse to one
        # grid step (saves the ~0.35 us per-step prologue, doubles MXU rows).
        batch_block = 1 if (_tensorcores_per_device() > 1 and B > 1) else B
    assert B % batch_block == 0
    grid = (B // batch_block,)

    kernel = functools.partial(attention_kernel, heads=heads)
    return pl.pallas_call(
        kernel,
        out_shape=jax.ShapeDtypeStruct((B, N, D), x.dtype),
        grid=grid,
        in_specs=[
            pl.BlockSpec((batch_block, N, D), lambda i: (i, 0, 0)),
            # Constant-index weight / bias blocks (DMA'd once per call).
            # Could be single-buffered via pipeline_mode=pl.Buffered(1);
            # negligible at D=32 so left at the default.
            pl.BlockSpec((D, 4 * D), lambda i: (0, 0)),
            pl.BlockSpec((1, D), lambda i: (0, 0)),
        ],
        out_specs=pl.BlockSpec((batch_block, N, D), lambda i: (i, 0, 0)),
        compiler_params=pltpu.CompilerParams(
            dimension_semantics=("parallel",)),
    )(x.astype(compute_dtype), w_slab, bias)


def attention_ref(x, w_qkv, w_out, b_out, *, heads):
    """Pure-JAX f32 reference matching the torch module's semantics."""
    B, N, D = x.shape
    d = D // heads
    qkv = jnp.einsum("bnd,de->bne", x, w_qkv)
    q, k, v = jnp.split(qkv, 3, axis=-1)

    def to_heads(t):  # 'b n (h d) -> b h n d'
        return t.reshape(B, N, heads, d).transpose(0, 2, 1, 3)

    q, k, v = map(to_heads, (q, k, v))
    s = jnp.einsum("bhnd,bhmd->bhnm", q, k) / jnp.sqrt(jnp.float32(d))
    p = jax.nn.softmax(s, axis=-1)
    o = jnp.einsum("bhnm,bhmd->bhnd", p, v)
    o = o.transpose(0, 2, 1, 3).reshape(B, N, D)  # 'b h n d -> b n (h d)'
    return jnp.einsum("bnd,de->bne", o, w_out) + b_out


if __name__ == "__main__":
    B, N, dim, heads = 2, 8, 32, 8

    key = jax.random.PRNGKey(0)
    kx, k1, k2, k3 = jax.random.split(key, 4)

    x = jax.random.normal(kx, (B, N, dim), dtype=jnp.float32)
    # nn.Linear-style uniform init (deterministic); stored as (in, out),
    # i.e. already transposed relative to torch's (out, in) weight.
    bound = 1.0 / jnp.sqrt(jnp.float32(dim))
    w_qkv = jax.random.uniform(k1, (dim, 3 * dim), jnp.float32, -bound, bound)
    w_out = jax.random.uniform(k2, (dim, dim), jnp.float32, -bound, bound)
    b_out = jax.random.uniform(k3, (dim,), jnp.float32, -bound, bound)

    # One-time parameter packing (hoisted out of the per-call path).
    w_slab, bias = jax.block_until_ready(
        prepare_params(w_qkv, w_out, b_out, heads=heads))

    out = attention(x, w_slab, bias, heads=heads)
    out = jax.block_until_ready(out)

    ref = attention_ref(x, w_qkv, w_out, b_out, heads=heads)
    assert out.shape == (B, N, dim)
    # bf16 MXU operands with f32 accumulation -> compare with bf16-level tol.
    err = float(jnp.max(jnp.abs(out - ref)))
    assert jnp.allclose(out, ref, atol=3e-2, rtol=3e-2), err

    print("KERNEL_OK")
</pallas_src>

<mosaic_0001>
module attributes {stable_mosaic.version = 11 : i64} {
  func.func @attention_kernel(%arg0: i32, %arg1: memref<2x8x32xbf16, #tpu.memory_space<vmem>>, %arg2: memref<32x128xbf16, #tpu.memory_space<vmem>>, %arg3: memref<1x32xf32, #tpu.memory_space<vmem>>, %arg4: memref<2x8x32xf32, #tpu.memory_space<vmem>>) attributes {dimension_semantics = [#tpu.dimension_semantics<parallel>], iteration_bounds = array<i64: 1>, scalar_prefetch = 0 : i64, scratch_operands = 0 : i64, tpu.core_type = #tpu.core_type<tc>, window_params = [{transform_indices = @transform_0, window_bounds = array<i64: 2, 8, 32>}, {pipeline_mode = #tpu.pipeline_mode<synchronous>, transform_indices = @transform_1, window_bounds = array<i64: 32, 128>}, {pipeline_mode = #tpu.pipeline_mode<synchronous>, transform_indices = @transform_2, window_bounds = array<i64: 1, 32>}, {transform_indices = @transform_3, window_bounds = array<i64: 2, 8, 32>}]} {
    %c0 = arith.constant 0 : index
    %c0_0 = arith.constant 0 : index
    %c0_1 = arith.constant 0 : index
    %0 = vector.load %arg1[%c0, %c0_0, %c0_1] : memref<2x8x32xbf16, #tpu.memory_space<vmem>>, vector<2x8x32xbf16>
    %c0_2 = arith.constant 0 : index
    %c0_3 = arith.constant 0 : index
    %1 = vector.load %arg2[%c0_2, %c0_3] : memref<32x128xbf16, #tpu.memory_space<vmem>>, vector<32x128xbf16>
    %2 = vector.shape_cast %0 : vector<2x8x32xbf16> to vector<16x32xbf16>
    %3 = vector.extract_strided_slice %1 {offsets = [0, 0], sizes = [32, 96], strides = [1, 1]} : vector<32x128xbf16> to vector<32x96xbf16>
    %cst = arith.constant dense<0.000000e+00> : vector<16x96xf32>
    %4 = tpu.matmul %2, %3, %cst {dimension_numbers = #tpu.dot_dimension_numbers<[1], [0], [0], [1], [0, 0, 1, 1], [], []>} : vector<16x32xbf16>, vector<32x96xbf16>, vector<16x96xf32> -> vector<16x96xf32>
    %5 = vector.extract_strided_slice %4 {offsets = [0, 0], sizes = [16, 4], strides = [1, 1]} : vector<16x96xf32> to vector<16x4xf32>
    %6 = vector.shape_cast %5 : vector<16x4xf32> to vector<1x2x8x4xf32>
    %7 = vector.extract_strided_slice %4 {offsets = [0, 4], sizes = [16, 4], strides = [1, 1]} : vector<16x96xf32> to vector<16x4xf32>
    %8 = vector.shape_cast %7 : vector<16x4xf32> to vector<1x2x8x4xf32>
    %9 = vector.extract_strided_slice %4 {offsets = [0, 8], sizes = [16, 4], strides = [1, 1]} : vector<16x96xf32> to vector<16x4xf32>
    %10 = vector.shape_cast %9 : vector<16x4xf32> to vector<1x2x8x4xf32>
    %11 = vector.extract_strided_slice %4 {offsets = [0, 12], sizes = [16, 4], strides = [1, 1]} : vector<16x96xf32> to vector<16x4xf32>
    %12 = vector.shape_cast %11 : vector<16x4xf32> to vector<1x2x8x4xf32>
    %13 = vector.extract_strided_slice %4 {offsets = [0, 16], sizes = [16, 4], strides = [1, 1]} : vector<16x96xf32> to vector<16x4xf32>
    %14 = vector.shape_cast %13 : vector<16x4xf32> to vector<1x2x8x4xf32>
    %15 = vector.extract_strided_slice %4 {offsets = [0, 20], sizes = [16, 4], strides = [1, 1]} : vector<16x96xf32> to vector<16x4xf32>
    %16 = vector.shape_cast %15 : vector<16x4xf32> to vector<1x2x8x4xf32>
    %17 = vector.extract_strided_slice %4 {offsets = [0, 24], sizes = [16, 4], strides = [1, 1]} : vector<16x96xf32> to vector<16x4xf32>
    %18 = vector.shape_cast %17 : vector<16x4xf32> to vector<1x2x8x4xf32>
    %19 = vector.extract_strided_slice %4 {offsets = [0, 28], sizes = [16, 4], strides = [1, 1]} : vector<16x96xf32> to vector<16x4xf32>
    %20 = vector.shape_cast %19 : vector<16x4xf32> to vector<1x2x8x4xf32>
    %21 = tpu.concatenate %6, %8, %10, %12, %14, %16, %18, %20 in 0 : vector<1x2x8x4xf32>, vector<1x2x8x4xf32>, vector<1x2x8x4xf32>, vector<1x2x8x4xf32>, vector<1x2x8x4xf32>, vector<1x2x8x4xf32>, vector<1x2x8x4xf32>, vector<1x2x8x4xf32> -> vector<8x2x8x4xf32>
    %22 = vector.shape_cast %21 : vector<8x2x8x4xf32> to vector<16x8x4xf32>
    %23 = arith.truncf %22 : vector<16x8x4xf32> to vector<16x8x4xbf16>
    %24 = vector.extract_strided_slice %4 {offsets = [0, 32], sizes = [16, 4], strides = [1, 1]} : vector<16x96xf32> to vector<16x4xf32>
    %25 = vector.shape_cast %24 : vector<16x4xf32> to vector<1x2x8x4xf32>
    %26 = vector.extract_strided_slice %4 {offsets = [0, 36], sizes = [16, 4], strides = [1, 1]} : vector<16x96xf32> to vector<16x4xf32>
    %27 = vector.shape_cast %26 : vector<16x4xf32> to vector<1x2x8x4xf32>
    %28 = vector.extract_strided_slice %4 {offsets = [0, 40], sizes = [16, 4], strides = [1, 1]} : vector<16x96xf32> to vector<16x4xf32>
    %29 = vector.shape_cast %28 : vector<16x4xf32> to vector<1x2x8x4xf32>
    %30 = vector.extract_strided_slice %4 {offsets = [0, 44], sizes = [16, 4], strides = [1, 1]} : vector<16x96xf32> to vector<16x4xf32>
    %31 = vector.shape_cast %30 : vector<16x4xf32> to vector<1x2x8x4xf32>
    %32 = vector.extract_strided_slice %4 {offsets = [0, 48], sizes = [16, 4], strides = [1, 1]} : vector<16x96xf32> to vector<16x4xf32>
    %33 = vector.shape_cast %32 : vector<16x4xf32> to vector<1x2x8x4xf32>
    %34 = vector.extract_strided_slice %4 {offsets = [0, 52], sizes = [16, 4], strides = [1, 1]} : vector<16x96xf32> to vector<16x4xf32>
    %35 = vector.shape_cast %34 : vector<16x4xf32> to vector<1x2x8x4xf32>
    %36 = vector.extract_strided_slice %4 {offsets = [0, 56], sizes = [16, 4], strides = [1, 1]} : vector<16x96xf32> to vector<16x4xf32>
    %37 = vector.shape_cast %36 : vector<16x4xf32> to vector<1x2x8x4xf32>
    %38 = vector.extract_strided_slice %4 {offsets = [0, 60], sizes = [16, 4], strides = [1, 1]} : vector<16x96xf32> to vector<16x4xf32>
    %39 = vector.shape_cast %38 : vector<16x4xf32> to vector<1x2x8x4xf32>
    %40 = tpu.concatenate %25, %27, %29, %31, %33, %35, %37, %39 in 0 : vector<1x2x8x4xf32>, vector<1x2x8x4xf32>, vector<1x2x8x4xf32>, vector<1x2x8x4xf32>, vector<1x2x8x4xf32>, vector<1x2x8x4xf32>, vector<1x2x8x4xf32>, vector<1x2x8x4xf32> -> vector<8x2x8x4xf32>
    %41 = vector.shape_cast %40 : vector<8x2x8x4xf32> to vector<16x8x4xf32>
    %42 = arith.truncf %41 : vector<16x8x4xf32> to vector<16x8x4xbf16>
    %43 = vector.extract_strided_slice %4 {offsets = [0, 64], sizes = [16, 4], strides = [1, 1]} : vector<16x96xf32> to vector<16x4xf32>
    %44 = vector.shape_cast %43 : vector<16x4xf32> to vector<1x2x8x4xf32>
    %45 = vector.extract_strided_slice %4 {offsets = [0, 68], sizes = [16, 4], strides = [1, 1]} : vector<16x96xf32> to vector<16x4xf32>
    %46 = vector.shape_cast %45 : vector<16x4xf32> to vector<1x2x8x4xf32>
    %47 = vector.extract_strided_slice %4 {offsets = [0, 72], sizes = [16, 4], strides = [1, 1]} : vector<16x96xf32> to vector<16x4xf32>
    %48 = vector.shape_cast %47 : vector<16x4xf32> to vector<1x2x8x4xf32>
    %49 = vector.extract_strided_slice %4 {offsets = [0, 76], sizes = [16, 4], strides = [1, 1]} : vector<16x96xf32> to vector<16x4xf32>
    %50 = vector.shape_cast %49 : vector<16x4xf32> to vector<1x2x8x4xf32>
    %51 = vector.extract_strided_slice %4 {offsets = [0, 80], sizes = [16, 4], strides = [1, 1]} : vector<16x96xf32> to vector<16x4xf32>
    %52 = vector.shape_cast %51 : vector<16x4xf32> to vector<1x2x8x4xf32>
    %53 = vector.extract_strided_slice %4 {offsets = [0, 84], sizes = [16, 4], strides = [1, 1]} : vector<16x96xf32> to vector<16x4xf32>
    %54 = vector.shape_cast %53 : vector<16x4xf32> to vector<1x2x8x4xf32>
    %55 = vector.extract_strided_slice %4 {offsets = [0, 88], sizes = [16, 4], strides = [1, 1]} : vector<16x96xf32> to vector<16x4xf32>
    %56 = vector.shape_cast %55 : vector<16x4xf32> to vector<1x2x8x4xf32>
    %57 = vector.extract_strided_slice %4 {offsets = [0, 92], sizes = [16, 4], strides = [1, 1]} : vector<16x96xf32> to vector<16x4xf32>
    %58 = vector.shape_cast %57 : vector<16x4xf32> to vector<1x2x8x4xf32>
    %59 = tpu.concatenate %44, %46, %48, %50, %52, %54, %56, %58 in 0 : vector<1x2x8x4xf32>, vector<1x2x8x4xf32>, vector<1x2x8x4xf32>, vector<1x2x8x4xf32>, vector<1x2x8x4xf32>, vector<1x2x8x4xf32>, vector<1x2x8x4xf32>, vector<1x2x8x4xf32> -> vector<8x2x8x4xf32>
    %60 = vector.shape_cast %59 : vector<8x2x8x4xf32> to vector<16x8x4xf32>
    %61 = arith.truncf %60 : vector<16x8x4xf32> to vector<16x8x4xbf16>
    "tpu.trace_start"() <{level = 10 : i32, message = "gnd,gmd->gnm"}> : () -> ()
    %cst_4 = arith.constant dense<0.000000e+00> : vector<16x8x8xf32>
    %62 = tpu.matmul %23, %42, %cst_4 {dimension_numbers = #tpu.dot_dimension_numbers<[2], [2], [1], [1], [0, 0, 0, 1, 1, 1], [0], [0]>} : vector<16x8x4xbf16>, vector<16x8x4xbf16>, vector<16x8x8xf32> -> vector<16x8x8xf32>
    "tpu.trace_stop"() : () -> ()
    %cst_5 = arith.constant dense<0xFF800000> : vector<16x8xf32>
    %63 = vector.multi_reduction <maximumf>, %62, %cst_5 [2] : vector<16x8x8xf32> to vector<16x8xf32>
    %64 = vector.shape_cast %63 : vector<16x8xf32> to vector<16x8x1xf32>
    %65 = vector.broadcast %64 : vector<16x8x1xf32> to vector<16x8x8xf32>
    %66 = arith.subf %62, %65 : vector<16x8x8xf32>
    %67 = math.exp %66 : vector<16x8x8xf32>
    %cst_6 = arith.constant dense<0.000000e+00> : vector<16x8xf32>
    %68 = vector.multi_reduction <add>, %67, %cst_6 [2] : vector<16x8x8xf32> to vector<16x8xf32>
    %69 = vector.shape_cast %68 : vector<16x8xf32> to vector<16x8x1xf32>
    %70 = arith.truncf %67 : vector<16x8x8xf32> to vector<16x8x8xbf16>
    "tpu.trace_start"() <{level = 10 : i32, message = "gnm,gmd->gnd"}> : () -> ()
    %cst_7 = arith.constant dense<0.000000e+00> : vector<16x8x4xf32>
    %71 = tpu.matmul %70, %61, %cst_7 {dimension_numbers = #tpu.dot_dimension_numbers<[2], [1], [1], [2], [0, 0, 0, 1, 1, 2], [0], [0]>} : vector<16x8x8xbf16>, vector<16x8x4xbf16>, vector<16x8x4xf32> -> vector<16x8x4xf32>
    "tpu.trace_stop"() : () -> ()
    %72 = tpu.reciprocal %69 {approx = true} : vector<16x8x1xf32> -> vector<16x8x1xf32>
    %73 = vector.broadcast %72 : vector<16x8x1xf32> to vector<16x8x4xf32>
    %74 = arith.mulf %71, %73 : vector<16x8x4xf32>
    %75 = vector.shape_cast %74 : vector<16x8x4xf32> to vector<8x2x8x4xf32>
    %76 = vector.extract_strided_slice %75 {offsets = [0, 0, 0, 0], sizes = [1, 2, 8, 4], strides = [1, 1, 1, 1]} : vector<8x2x8x4xf32> to vector<1x2x8x4xf32>
    %77 = vector.shape_cast %76 : vector<1x2x8x4xf32> to vector<2x8x4xf32>
    %78 = vector.shape_cast %77 : vector<2x8x4xf32> to vector<16x4xf32>
    %79 = vector.extract_strided_slice %75 {offsets = [1, 0, 0, 0], sizes = [1, 2, 8, 4], strides = [1, 1, 1, 1]} : vector<8x2x8x4xf32> to vector<1x2x8x4xf32>
    %80 = vector.shape_cast %79 : vector<1x2x8x4xf32> to vector<2x8x4xf32>
    %81 = vector.shape_cast %80 : vector<2x8x4xf32> to vector<16x4xf32>
    %82 = vector.extract_strided_slice %75 {offsets = [2, 0, 0, 0], sizes = [1, 2, 8, 4], strides = [1, 1, 1, 1]} : vector<8x2x8x4xf32> to vector<1x2x8x4xf32>
    %83 = vector.shape_cast %82 : vector<1x2x8x4xf32> to vector<2x8x4xf32>
    %84 = vector.shape_cast %83 : vector<2x8x4xf32> to vector<16x4xf32>
    %85 = vector.extract_strided_slice %75 {offsets = [3, 0, 0, 0], sizes = [1, 2, 8, 4], strides = [1, 1, 1, 1]} : vector<8x2x8x4xf32> to vector<1x2x8x4xf32>
    %86 = vector.shape_cast %85 : vector<1x2x8x4xf32> to vector<2x8x4xf32>
    %87 = vector.shape_cast %86 : vector<2x8x4xf32> to vector<16x4xf32>
    %88 = vector.extract_strided_slice %75 {offsets = [4, 0, 0, 0], sizes = [1, 2, 8, 4], strides = [1, 1, 1, 1]} : vector<8x2x8x4xf32> to vector<1x2x8x4xf32>
    %89 = vector.shape_cast %88 : vector<1x2x8x4xf32> to vector<2x8x4xf32>
    %90 = vector.shape_cast %89 : vector<2x8x4xf32> to vector<16x4xf32>
    %91 = vector.extract_strided_slice %75 {offsets = [5, 0, 0, 0], sizes = [1, 2, 8, 4], strides = [1, 1, 1, 1]} : vector<8x2x8x4xf32> to vector<1x2x8x4xf32>
    %92 = vector.shape_cast %91 : vector<1x2x8x4xf32> to vector<2x8x4xf32>
    %93 = vector.shape_cast %92 : vector<2x8x4xf32> to vector<16x4xf32>
    %94 = vector.extract_strided_slice %75 {offsets = [6, 0, 0, 0], sizes = [1, 2, 8, 4], strides = [1, 1, 1, 1]} : vector<8x2x8x4xf32> to vector<1x2x8x4xf32>
    %95 = vector.shape_cast %94 : vector<1x2x8x4xf32> to vector<2x8x4xf32>
    %96 = vector.shape_cast %95 : vector<2x8x4xf32> to vector<16x4xf32>
    %97 = vector.extract_strided_slice %75 {offsets = [7, 0, 0, 0], sizes = [1, 2, 8, 4], strides = [1, 1, 1, 1]} : vector<8x2x8x4xf32> to vector<1x2x8x4xf32>
    %98 = vector.shape_cast %97 : vector<1x2x8x4xf32> to vector<2x8x4xf32>
    %99 = vector.shape_cast %98 : vector<2x8x4xf32> to vector<16x4xf32>
    %100 = tpu.concatenate %78, %81, %84, %87, %90, %93, %96, %99 in 1 : vector<16x4xf32>, vector<16x4xf32>, vector<16x4xf32>, vector<16x4xf32>, vector<16x4xf32>, vector<16x4xf32>, vector<16x4xf32>, vector<16x4xf32> -> vector<16x32xf32>
    %101 = arith.truncf %100 : vector<16x32xf32> to vector<16x32xbf16>
    %102 = vector.extract_strided_slice %1 {offsets = [0, 96], sizes = [32, 32], strides = [1, 1]} : vector<32x128xbf16> to vector<32x32xbf16>
    %cst_8 = arith.constant dense<0.000000e+00> : vector<16x32xf32>
    %103 = tpu.matmul %101, %102, %cst_8 {dimension_numbers = #tpu.dot_dimension_numbers<[1], [0], [0], [1], [0, 0, 1, 1], [], []>} : vector<16x32xbf16>, vector<32x32xbf16>, vector<16x32xf32> -> vector<16x32xf32>
    %c0_9 = arith.constant 0 : index
    %c0_10 = arith.constant 0 : index
    %104 = vector.load %arg3[%c0_9, %c0_10] : memref<1x32xf32, #tpu.memory_space<vmem>>, vector<1x32xf32>
    %105 = vector.broadcast %104 : vector<1x32xf32> to vector<16x32xf32>
    %106 = arith.addf %103, %105 : vector<16x32xf32>
    %107 = vector.shape_cast %106 : vector<16x32xf32> to vector<2x8x32xf32>
    %c0_11 = arith.constant 0 : index
    %c0_12 = arith.constant 0 : index
    %c0_13 = arith.constant 0 : index
    %108 = vector.load %arg4[%c0_11, %c0_12, %c0_13] : memref<2x8x32xf32, #tpu.memory_space<vmem>>, vector<2x8x32xf32>
    tpu.vector_store %arg4[%c0_11, %c0_12, %c0_13], %107 {strides = array<i32>} : memref<2x8x32xf32, #tpu.memory_space<vmem>>, vector<2x8x32xf32>,
    return
  }
  func.func @transform_0(%arg0: i32) -> (i32, i32, i32) {
    %c0_i32 = arith.constant 0 : i32
    %c0_i32_0 = arith.constant 0 : i32
    %c0_i32_1 = arith.constant 0 : i32
    return %arg0, %c0_i32, %c0_i32_0 : i32, i32, i32
  }
  func.func @transform_1(%arg0: i32) -> (i32, i32) {
    %c0_i32 = arith.constant 0 : i32
    %c0_i32_0 = arith.constant 0 : i32
    %c0_i32_1 = arith.constant 0 : i32
    return %c0_i32, %c0_i32_0 : i32, i32
  }
  func.func @transform_2(%arg0: i32) -> (i32, i32) {
    %c0_i32 = arith.constant 0 : i32
    %c0_i32_0 = arith.constant 0 : i32
    %c0_i32_1 = arith.constant 0 : i32
    return %c0_i32, %c0_i32_0 : i32, i32
  }
  func.func @transform_3(%arg0: i32) -> (i32, i32, i32) {
    %c0_i32 = arith.constant 0 : i32
    %c0_i32_0 = arith.constant 0 : i32
    %c0_i32_1 = arith.constant 0 : i32
    return %arg0, %c0_i32, %c0_i32_0 : i32, i32, i32
  }
}

</mosaic_0001>

<bundles_post_ra>
// kernel: attention.1
= control target key start
LH: loop header
LB: loop body
LE: loop exit
PB: predicated region body
PF: predicated region fallthrough
CT: control target
= control target key end

     0   :  { %v2542_v1 = vmov 0.0   ;;  %vm2543_vm0 = vmmov 0   ;;  %s3059_s0 = inlined_call_operand.vmem [shape: bf16[2,8,32], index: 0, kind: input, shape index: {}]   ;;  %s3060_s1 = inlined_call_operand.vmem [shape: bf16[32,128], index: 1, kind: input, shape index: {}]   ;;  %s3061_s2 = inlined_call_operand.vmem [shape: f32[1,32], index: 2, kind: input, shape index: {}]   ;;  %s3062_s3 = inlined_call_operand.hbm [shape: f32[2,8,32], index: 3, kind: output, shape index: {}]  }
   0x1   :  { %v2449_v0 = vld [vmem:[%s3060_s1] sm:$0xff]   ;;  %2150 = vmatprep.subr.bf16.mxu0 %v2542_v1  ;;  %2158 = vmatprep.subr.bf16.mxu1 %v2542_v1  ;;  %v2450_v2 = vld [vmem:[%s3060_s1 + $0x8] sm:$0xff]  }
   0x2   :  { %2151 = vmatpush3.bf16.msra.mxu0 %v2449_v0  ;;  %2154 = vmatprep.mubr.msk.bf16.mxu0 %vm2543_vm0, %v2542_v1 }
   0x3   :  { %2152 = vmatprep.subr.bf16.mxu0 %v2542_v1  ;;  %2160 = vmatprep.mubr.msk.bf16.mxu1 %vm2543_vm0, %v2542_v1 }
   0x4   :  { %8 = vsyncpa [#allocation3], 0  ;;  %v2451_v3 = vld [vmem:[%s3059_s0] sm:$0xff]   ;;  %vm39_vm1 = vcmask 261120   ;;  %s2544_s18 = smov 116   ;;  %s2545_s19 = smov 124  }
   0x5   :  { %s2546_s20 = smov 112   ;;  %s2547_s0 = smov 120   ;;  %vm147_vm2 = vcmask 31744   ;;  %vm1095_vm3 = vcmask 1043456   ;;  %vm929_vm4 = vcmask 64512   ;;  %vm1951_vm5 = vcmask 97280  }
   0x6   :  { %2153 = vmatpush3.bf16.msra.mxu0 %v2450_v2  ;;  %s2548_s21 = smov 104   ;;  %s2549_s22 = smov 108   ;;  %vm1954_vm6 = vcmask 130048   ;;  %vm1957_vm7 = vcmask 162816   ;;  %vm1960_vm8 = vcmask 195584   ;;  %vm1963_vm9 = vcmask 228352  }
   0x7   :  { %2164 = vmatprep.subr.bf16.mxu0 %v2542_v1  ;;  %s2550_s23 = smov 96   ;;  %s2551_s24 = smov 100  }
   0x8   :  { %s2552_s25 = smov 64   ;;  %s2553_s28 = smov 32  }
   0x9   :  { %2155 = vmatmul.mubr.msk.bf16.vlgmr.msra.gmra.mrb[0].mxu0 %vm39_vm1, %v2451_v3  ;;  %s2554_s29 = smov 4   ;;  %s2555_s30 = smov 8  }
   0xa   :  { %2166 = vmatprep.mubr.msk.bf16.mxu0 %vm2543_vm0, %v2542_v1  ;;  %s2556_s4 = smov 12   ;;  %s2557_s5 = smov 16  }
   0xb   :  { %s2558_s6 = smov 20   ;;  %s2559_s7 = smov 24  }
   0xc   :  { %s2560_s10 = smov 28   ;;  %s2561_s12 = smov [#allocation2]  }
   0xd   :  { %s2031_s13 = sshll.u32 %s2561_s12, 4  ;;  %s2032_s13 = int_to_ptr.vmem [resolvable:$true] %s2031_s13 }
   0xe   :  { %s2518_s14 = scalar_lea.vmem %s2032_s13, 256  ;;  %p2523_p1 = scmp.lt.s32.totalorder %s2032_s13, %s2032_s13 }
   0xf   :  { %p2519_p0 = scmp.ne.s32.totalorder %s2032_s13, %s2518_s14  ;;  %p2524_p2 = scmp.lt.s32.totalorder %s2518_s14, %s2518_s14 }
  0x11   :  { %p2525_p3 = por %p2524_p2, %p2523_p1 }
  0x13   :  { %p2526_p4 = pnand %p2525_p3, %p2519_p0 }
  0xdc   :  { %v77_v4 = vpop.f32.mrb[0].mxu0 }
  0xdd   :  { %v2156_v5 = vpop.f32.mrb[1].mxu0  ;;  %v2603_v9 = vpack.c.bf16 %v77_v4, %v77_v4 }
  0xde   :  { %v80_v6 = vpop.f32.mrb[2].mxu0 }
  0xdf   :  { %v2157_v7 = vpop.f32.mrb[3].mxu0  ;;  %v2389_v8 = vpack.i.bf16 %v80_v6, %v77_v4  ;;  %v2607_v10 = vpack.c.bf16 %v80_v6, %v80_v6 }
  0xe1   :  { %2390 = vrot.lane.b32.xlu1 %v2389_v8, %s2544_s18  ;;  %2380 = vrot.lane.b32.xlu0 %v2389_v8, %s2545_s19 }
  0xe5   :  { %2395 = vrot.lane.b32.xlu1 %v2389_v8, %s2546_s20  ;;  %2385 = vrot.lane.b32.xlu0 %v2389_v8, %s2547_s0 }
  0xe9   :  { %2405 = vrot.lane.b32.xlu1 %v2389_v8, %s2548_s21  ;;  %2400 = vrot.lane.b32.xlu0 %v2389_v8, %s2549_s22 }
  0xed   :  { %145 = vrot.lane.b32.xlu1 %v2603_v9, %s2550_s23  ;;  %2410 = vrot.lane.b32.xlu0 %v2389_v8, %s2551_s24 }
  0xf1   :  { %195 = vrot.lane.b32.xlu0 %v2607_v10, %s2550_s23 }
 0x153   :  { %v2391_v11 = vpop.permute.xlu1 %2390  ;;  %v2381_v12 = vpop.permute.xlu0 %2380 }
 0x154   :  { %v2383_v13 = vunpack.i.h.bf16 %v2381_v12  ;;  %v2382_v14 = vunpack.i.l.bf16 %v2381_v12  ;;  %v2393_v21 = vunpack.i.h.bf16 %v2391_v11  ;;  %v2392_v22 = vunpack.i.l.bf16 %v2391_v11 }
 0x156   :  { %v2611_v15 = vpack.c.bf16 %v2383_v13, %v2383_v13  ;;  %v2613_v16 = vpack.c.bf16 %v2382_v14, %v2382_v14  ;;  %v2627_v27 = vpack.c.bf16 %v2393_v21, %v2393_v21  ;;  %v2629_v28 = vpack.c.bf16 %v2392_v22, %v2392_v22 }
 0x157   :  { %v2396_v17 = vpop.permute.xlu1 %2395  ;;  %v2386_v18 = vpop.permute.xlu0 %2385 }
 0x158   :  { %v2388_v19 = vunpack.i.h.bf16 %v2386_v18  ;;  %v2387_v20 = vunpack.i.l.bf16 %v2386_v18  ;;  %244 = vrot.lane.b32.xlu1 %v2613_v16, %s2550_s23  ;;  %293 = vrot.lane.b32.xlu0 %v2611_v15, %s2550_s23  ;;  %v2398_v29 = vunpack.i.h.bf16 %v2396_v17  ;;  %v2397_v30 = vunpack.i.l.bf16 %v2396_v17 }
 0x15a   :  { %v2619_v23 = vpack.c.bf16 %v2388_v19, %v2388_v19  ;;  %v2621_v24 = vpack.c.bf16 %v2387_v20, %v2387_v20  ;;  %v2636_v34 = vpack.c.bf16 %v2398_v29, %v2398_v29  ;;  %v2638_v35 = vpack.c.bf16 %v2397_v30, %v2397_v30 }
 0x15b   :  { %v2406_v25 = vpop.permute.xlu1 %2405  ;;  %v2401_v26 = vpop.permute.xlu0 %2400 }
 0x15c   :  { %342 = vrot.lane.b32.xlu1 %v2621_v24, %s2550_s23  ;;  %391 = vrot.lane.b32.xlu0 %v2619_v23, %s2550_s23  ;;  %v2402_v36 = vunpack.i.l.bf16 %v2401_v26  ;;  %v2403_v37 = vunpack.i.h.bf16 %v2401_v26  ;;  %v2407_v40 = vunpack.i.l.bf16 %v2406_v25  ;;  %v2408_v42 = vunpack.i.h.bf16 %v2406_v25 }
 0x15e   :  { %v2646_v41 = vpack.c.bf16 %v2402_v36, %v2402_v36  ;;  %v2649_v43 = vpack.c.bf16 %v2403_v37, %v2403_v37  ;;  %v2659_v44 = vpack.c.bf16 %v2407_v40, %v2407_v40  ;;  %v2661_v46 = vpack.c.bf16 %v2408_v42, %v2408_v42 }
 0x15f   :  { %v146_v31 = vpop.permute.xlu1 %145  ;;  %v2411_v32 = vpop.permute.xlu0 %2410 }
 0x160   :  { %440 = vrot.lane.b32.xlu1 %v2629_v28, %s2550_s23  ;;  %489 = vrot.lane.b32.xlu0 %v2627_v27, %s2550_s23  ;;  %v152_v33 = vsel %vm147_vm2, %v146_v31, 0  ;;  %v2412_v45 = vunpack.i.l.bf16 %v2411_v32  ;;  %v2413_v47 = vunpack.i.h.bf16 %v2411_v32 }
 0x161   :  { %2159 = vmatpush3.bf16.xpose.msra.mxu1 %v152_v33 }
 0x162   :  { %2170 = vmatprep.subr.bf16.mxu1 %v2542_v1  ;;  %v2671_v48 = vpack.c.bf16 %v2412_v45, %v2412_v45  ;;  %v2673_v49 = vpack.c.bf16 %v2413_v47, %v2413_v47 }
 0x163   :  { %v196_v38 = vpop.permute.xlu0 %195 }
 0x164   :  { %v201_v39 = vsel %vm147_vm2, %v196_v38, 0  ;;  %538 = vrot.lane.b32.xlu1 %v2638_v35, %s2550_s23  ;;  %587 = vrot.lane.b32.xlu0 %v2636_v34, %s2550_s23 }
 0x165   :  { %2165 = vmatpush3.bf16.xpose.msra.mxu0 %v201_v39 }
 0x166   :  { %2176 = vmatprep.subr.bf16.mxu0 %v2542_v1 }
 0x168   :  { %2161 = vmatmul.mubr.msk.bf16.vlgmr.msra.gmra.mrb[0].mxu1 %vm147_vm2, %v2603_v9  ;;  %636 = vrot.lane.b32.xlu1 %v2646_v41, %s2550_s23 }
 0x169   :  { %685 = vrot.lane.b32.xlu0 %v2649_v43, %s2550_s23  ;;  %2172 = vmatprep.mubr.msk.bf16.mxu1 %vm2543_vm0, %v2542_v1 }
 0x16c   :  { %734 = vrot.lane.b32.xlu1 %v2659_v44, %s2550_s23  ;;  %2167 = vmatmul.mubr.msk.bf16.vlgmr.msra.gmra.mrb[4].mxu0 %vm147_vm2, %v2607_v10 }
 0x16d   :  { %783 = vrot.lane.b32.xlu0 %v2661_v46, %s2550_s23  ;;  %2178 = vmatprep.mubr.msk.bf16.mxu0 %vm2543_vm0, %v2542_v1 }
 0x170   :  { %832 = vrot.lane.b32.xlu1 %v2671_v48, %s2550_s23 }
 0x171   :  { %881 = vrot.lane.b32.xlu0 %v2673_v49, %s2550_s23 }
 0x174   :  { %1139 = vrot.lane.b32.xlu1 %v2607_v10, %s2552_s25 }
 0x175   :  { %1090 = vrot.lane.b32.xlu0 %v2603_v9, %s2552_s25 }
 0x178   :  { %1571 = vrot.lane.b32.xlu1 %v2646_v41, %s2552_s25 }
 0x179   :  { %1187 = vrot.lane.b32.xlu0 %v2613_v16, %s2552_s25 }
 0x17c   :  { %1235 = vrot.lane.b32.xlu1 %v2611_v15, %s2552_s25 }
 0x17d   :  { %1283 = vrot.lane.b32.xlu0 %v2621_v24, %s2552_s25 }
 0x180   :  { %1331 = vrot.lane.b32.xlu1 %v2619_v23, %s2552_s25 }
 0x181   :  { %1379 = vrot.lane.b32.xlu0 %v2629_v28, %s2552_s25 }
 0x184   :  { %1427 = vrot.lane.b32.xlu1 %v2627_v27, %s2552_s25 }
 0x185   :  { %1475 = vrot.lane.b32.xlu0 %v2638_v35, %s2552_s25 }
 0x188   :  { %1523 = vrot.lane.b32.xlu1 %v2636_v34, %s2552_s25 }
 0x189   :  { %1619 = vrot.lane.b32.xlu0 %v2649_v43, %s2552_s25 }
 0x1ca   :  { %v245_v50 = vpop.permute.xlu1 %244  ;;  %v294_v51 = vpop.permute.xlu0 %293 }
 0x1cb   :  { %v250_v52 = vsel %vm147_vm2, %v245_v50, 0  ;;  %v299_v53 = vsel %vm147_vm2, %v294_v51, 0 }
 0x1cc   :  { %2171 = vmatpush3.bf16.xpose.msra.mxu1 %v250_v52  ;;  %2177 = vmatpush3.bf16.xpose.msra.mxu0 %v299_v53 }
 0x1cd   :  { %2182 = vmatprep.subr.bf16.mxu1 %v2542_v1  ;;  %2188 = vmatprep.subr.bf16.mxu0 %v2542_v1 }
 0x1ce   :  { %v343_v54 = vpop.permute.xlu1 %342  ;;  %v392_v55 = vpop.permute.xlu0 %391 }
 0x1cf   :  { %v348_v56 = vsel %vm147_vm2, %v343_v54, 0  ;;  %v397_v57 = vsel %vm147_vm2, %v392_v55, 0 }
 0x1d2   :  { %v441_v58 = vpop.permute.xlu1 %440  ;;  %v490_v59 = vpop.permute.xlu0 %489 }
 0x1d3   :  { %2173 = vmatmul.mubr.msk.bf16.vlgmr.msra.gmra.mrb[4].mxu1 %vm147_vm2, %v2613_v16  ;;  %2179 = vmatmul.mubr.msk.bf16.vlgmr.msra.gmra.mrb[8].mxu0 %vm147_vm2, %v2611_v15  ;;  %v446_v60 = vsel %vm147_vm2, %v441_v58, 0  ;;  %v495_v61 = vsel %vm147_vm2, %v490_v59, 0 }
 0x1d4   :  { %2183 = vmatpush3.bf16.xpose.msra.mxu1 %v348_v56  ;;  %2189 = vmatpush3.bf16.xpose.msra.mxu0 %v397_v57 }
 0x1d5   :  { %2184 = vmatprep.mubr.msk.bf16.mxu1 %vm2543_vm0, %v2542_v1  ;;  %2190 = vmatprep.mubr.msk.bf16.mxu0 %vm2543_vm0, %v2542_v1 }
 0x1d6   :  { %2194 = vmatprep.subr.bf16.mxu1 %v2542_v1  ;;  %2200 = vmatprep.subr.bf16.mxu0 %v2542_v1  ;;  %v539_v62 = vpop.permute.xlu1 %538  ;;  %v588_v63 = vpop.permute.xlu0 %587 }
 0x1d7   :  { %v544_v0 = vsel %vm147_vm2, %v539_v62, 0  ;;  %v593_v2 = vsel %vm147_vm2, %v588_v63, 0 }
 0x1da   :  { %v637_v3 = vpop.permute.xlu1 %636 }
 0x1db   :  { %2185 = vmatmul.mubr.msk.bf16.vlgmr.msra.gmra.mrb[8].mxu1 %vm147_vm2, %v2621_v24  ;;  %2191 = vmatmul.mubr.msk.bf16.vlgmr.msra.gmra.mrb[12].mxu0 %vm147_vm2, %v2619_v23  ;;  %v686_v4 = vpop.permute.xlu0 %685  ;;  %v642_v5 = vsel %vm147_vm2, %v637_v3, 0 }
 0x1dc   :  { %2195 = vmatpush3.bf16.xpose.msra.mxu1 %v446_v60  ;;  %2201 = vmatpush3.bf16.xpose.msra.mxu0 %v495_v61  ;;  %v691_v6 = vsel %vm147_vm2, %v686_v4, 0 }
 0x1dd   :  { %2196 = vmatprep.mubr.msk.bf16.mxu1 %vm2543_vm0, %v2542_v1  ;;  %2202 = vmatprep.mubr.msk.bf16.mxu0 %vm2543_vm0, %v2542_v1 }
 0x1de   :  { %2206 = vmatprep.subr.bf16.mxu1 %v2542_v1  ;;  %2212 = vmatprep.subr.bf16.mxu0 %v2542_v1  ;;  %v735_v7 = vpop.permute.xlu1 %734 }
 0x1df   :  { %v784_v8 = vpop.permute.xlu0 %783  ;;  %v740_v9 = vsel %vm147_vm2, %v735_v7, 0 }
 0x1e0   :  { %v789_v10 = vsel %vm147_vm2, %v784_v8, 0 }
 0x1e2   :  { %v833_v11 = vpop.permute.xlu1 %832 }
 0x1e3   :  { %2197 = vmatmul.mubr.msk.bf16.vlgmr.msra.gmra.mrb[12].mxu1 %vm147_vm2, %v2629_v28  ;;  %2203 = vmatmul.mubr.msk.bf16.vlgmr.msra.gmra.mrb[16].mxu0 %vm147_vm2, %v2627_v27  ;;  %v882_v12 = vpop.permute.xlu0 %881  ;;  %v838_v13 = vsel %vm147_vm2, %v833_v11, 0 }
 0x1e4   :  { %2207 = vmatpush3.bf16.xpose.msra.mxu1 %v544_v0  ;;  %2213 = vmatpush3.bf16.xpose.msra.mxu0 %v593_v2  ;;  %v887_v14 = vsel %vm147_vm2, %v882_v12, 0 }
 0x1e5   :  { %2208 = vmatprep.mubr.msk.bf16.mxu1 %vm2543_vm0, %v2542_v1  ;;  %2214 = vmatprep.mubr.msk.bf16.mxu0 %vm2543_vm0, %v2542_v1 }
 0x1e6   :  { %2218 = vmatprep.subr.bf16.mxu1 %v2542_v1  ;;  %2224 = vmatprep.subr.bf16.mxu0 %v2542_v1  ;;  %v1140_v15 = vpop.permute.xlu1 %1139 }
 0x1e7   :  { %v1091_v16 = vpop.permute.xlu0 %1090  ;;  %v1145_v17 = vsel %vm1095_vm3, %v1140_v15, 0 }
 0x1e8   :  { %v1097_v18 = vsel %vm1095_vm3, %v1091_v16, 0 }
 0x1ea   :  { %v2799_v29 = vpop.permute.xlu1 %1571 }
 0x1eb   :  { %2209 = vmatmul.mubr.msk.bf16.vlgmr.msra.gmra.mrb[16].mxu1 %vm147_vm2, %v2638_v35  ;;  %2215 = vmatmul.mubr.msk.bf16.vlgmr.msra.gmra.mrb[20].mxu0 %vm147_vm2, %v2636_v34  ;;  %v2809_v40 = vpop.permute.xlu0 %1187 }
 0x1ec   :  { %2219 = vmatpush3.bf16.xpose.msra.mxu1 %v642_v5  ;;  %2225 = vmatpush3.bf16.xpose.msra.mxu0 %v691_v6 }
 0x1ed   :  { %2220 = vmatprep.mubr.msk.bf16.mxu1 %vm2543_vm0, %v2542_v1  ;;  %2226 = vmatprep.mubr.msk.bf16.mxu0 %vm2543_vm0, %v2542_v1 }
 0x1ee   :  { %2230 = vmatprep.subr.bf16.mxu1 %v2542_v1  ;;  %2236 = vmatprep.subr.bf16.mxu0 %v2542_v1 }
 0x1ef   :  { %v2821_v56 = vpop.permute.xlu0 %1283 }
 0x1f3   :  { %2221 = vmatmul.mubr.msk.bf16.vlgmr.msra.gmra.mrb[20].mxu1 %vm147_vm2, %v2646_v41  ;;  %2227 = vmatmul.mubr.msk.bf16.vlgmr.msra.gmra.mrb[24].mxu0 %vm147_vm2, %v2649_v43  ;;  %v2811_v41 = vpop.permute.xlu1 %1235  ;;  %v2833_v5 = vpop.permute.xlu0 %1379 }
 0x1f4   :  { %2231 = vmatpush3.bf16.xpose.msra.mxu1 %v740_v9  ;;  %2237 = vmatpush3.bf16.xpose.msra.mxu0 %v789_v10 }
 0x1f5   :  { %2232 = vmatprep.mubr.msk.bf16.mxu1 %vm2543_vm0, %v2542_v1  ;;  %2238 = vmatprep.mubr.msk.bf16.mxu0 %vm2543_vm0, %v2542_v1 }
 0x1f6   :  { %2242 = vmatprep.subr.bf16.mxu1 %v2542_v1  ;;  %2248 = vmatprep.subr.bf16.mxu0 %v2542_v1 }
 0x1f7   :  { %v2823_v57 = vpop.permute.xlu1 %1331 }
 0x1fb   :  { %2233 = vmatmul.mubr.msk.bf16.vlgmr.msra.gmra.mrb[24].mxu1 %vm147_vm2, %v2659_v44  ;;  %2239 = vmatmul.mubr.msk.bf16.vlgmr.msra.gmra.mrb[28].mxu0 %vm147_vm2, %v2661_v46  ;;  %v2835_v6 = vpop.permute.xlu1 %1427 }
 0x1fc   :  { %2243 = vmatpush3.bf16.xpose.msra.mxu1 %v838_v13  ;;  %2249 = vmatpush3.bf16.xpose.msra.mxu0 %v887_v14 }
 0x1fd   :  { %2244 = vmatprep.mubr.msk.bf16.mxu1 %vm2543_vm0, %v2542_v1  ;;  %2250 = vmatprep.mubr.msk.bf16.mxu0 %vm2543_vm0, %v2542_v1 }
 0x1fe   :  { %2254 = vmatprep.subr.bf16.mxu1 %v2542_v1  ;;  %2260 = vmatprep.subr.bf16.mxu0 %v2542_v1 }
 0x203   :  { %2245 = vmatmul.mubr.msk.bf16.vlgmr.msra.gmra.mrb[28].mxu1 %vm147_vm2, %v2671_v48  ;;  %2251 = vmatmul.mubr.msk.bf16.vlgmr.msra.gmra.mrb[32].mxu0 %vm147_vm2, %v2673_v49 }
 0x204   :  { %2255 = vmatpush3.bf16.msra.mxu1 %v1097_v18  ;;  %2261 = vmatpush3.bf16.msra.mxu0 %v1145_v17  ;;  %v2845_v17 = vpop.permute.xlu0 %1475  ;;  %v2847_v18 = vpop.permute.xlu1 %1523 }
 0x205   :  { %2256 = vmatprep.mubr.msk.bf16.mxu1 %vm2543_vm0, %v2542_v1  ;;  %2266 = vmatprep.subr.bf16.mxu1 %v2542_v1 }
 0x206   :  { %2262 = vmatprep.mubr.msk.bf16.mxu0 %vm2543_vm0, %v2542_v1  ;;  %2272 = vmatprep.subr.bf16.mxu0 %v2542_v1 }
 0x23b   :  { %v2791_v19 = vpop.f32.mrb[0].mxu1 }
 0x23c   :  { %v2162_v20 = vpop.f32.mrb[1].mxu1  ;;  %v930_v21 = vsel %vm929_vm4, %v2791_v19, -inf }
 0x23d   :  { %v191_v22 = vpop.f32.mrb[2].mxu1  ;;  %931 = vmax.xlane.f32.xlu1 %v930_v21 }
 0x23e   :  { %v2163_v23 = vpop.f32.mrb[3].mxu1 }
 0x23f   :  { %v2795_v24 = vpop.f32.mrb[4].mxu0 }
 0x240   :  { %v2168_v25 = vpop.f32.mrb[5].mxu0  ;;  %v933_v26 = vsel %vm929_vm4, %v2795_v24, -inf }
 0x241   :  { %934 = vmax.xlane.f32.xlu0 %v933_v26  ;;  %v240_v27 = vpop.f32.mrb[6].mxu0 }
 0x242   :  { %v2169_v28 = vpop.f32.mrb[7].mxu0 }
 0x2a6   :  { %v2801_v30 = vpop.f32.mrb[4].mxu1  ;;  %v2803_v31 = vpop.f32.mrb[8].mxu0 }
 0x2a7   :  { %v2174_v32 = vpop.f32.mrb[5].mxu1  ;;  %v2180_v33 = vpop.f32.mrb[9].mxu0  ;;  %v936_v34 = vsel %vm929_vm4, %v2801_v30, -inf  ;;  %v939_v35 = vsel %vm929_vm4, %v2803_v31, -inf }
 0x2a8   :  { %v289_v36 = vpop.f32.mrb[6].mxu1  ;;  %937 = vmax.xlane.f32.xlu0 %v936_v34  ;;  %940 = vmax.xlane.f32.xlu1 %v939_v35  ;;  %v338_v37 = vpop.f32.mrb[10].mxu0 }
 0x2a9   :  { %v2175_v38 = vpop.f32.mrb[7].mxu1  ;;  %v2181_v39 = vpop.f32.mrb[11].mxu0 }
 0x2aa   :  { %v2855_v33 = vpop.permute.xlu0 %1619 }
 0x2ae   :  { %v2813_v42 = vpop.f32.mrb[8].mxu1  ;;  %v2815_v43 = vpop.f32.mrb[12].mxu0 }
 0x2af   :  { %v2186_v45 = vpop.f32.mrb[9].mxu1  ;;  %v2192_v47 = vpop.f32.mrb[13].mxu0  ;;  %v942_v50 = vsel %vm929_vm4, %v2813_v42, -inf  ;;  %v945_v51 = vsel %vm929_vm4, %v2815_v43, -inf }
 0x2b0   :  { %v387_v52 = vpop.f32.mrb[10].mxu1  ;;  %943 = vmax.xlane.f32.xlu0 %v942_v50  ;;  %946 = vmax.xlane.f32.xlu1 %v945_v51  ;;  %v436_v53 = vpop.f32.mrb[14].mxu0 }
 0x2b1   :  { %v2187_v54 = vpop.f32.mrb[11].mxu1  ;;  %v2193_v55 = vpop.f32.mrb[15].mxu0 }
 0x2b6   :  { %v2825_v58 = vpop.f32.mrb[12].mxu1  ;;  %v2827_v59 = vpop.f32.mrb[16].mxu0 }
 0x2b7   :  { %v2198_v60 = vpop.f32.mrb[13].mxu1  ;;  %v2204_v61 = vpop.f32.mrb[17].mxu0  ;;  %v948_v62 = vsel %vm929_vm4, %v2825_v58, -inf  ;;  %v951_v63 = vsel %vm929_vm4, %v2827_v59, -inf }
 0x2b8   :  { %v485_v0 = vpop.f32.mrb[14].mxu1  ;;  %949 = vmax.xlane.f32.xlu0 %v948_v62  ;;  %952 = vmax.xlane.f32.xlu1 %v951_v63  ;;  %v534_v2 = vpop.f32.mrb[18].mxu0 }
 0x2b9   :  { %v2199_v3 = vpop.f32.mrb[15].mxu1  ;;  %v2205_v4 = vpop.f32.mrb[19].mxu0 }
 0x2be   :  { %v2837_v7 = vpop.f32.mrb[16].mxu1  ;;  %v2839_v8 = vpop.f32.mrb[20].mxu0 }
 0x2bf   :  { %v2210_v9 = vpop.f32.mrb[17].mxu1  ;;  %v2216_v10 = vpop.f32.mrb[21].mxu0  ;;  %v954_v11 = vsel %vm929_vm4, %v2837_v7, -inf  ;;  %v957_v12 = vsel %vm929_vm4, %v2839_v8, -inf }
 0x2c0   :  { %v583_v13 = vpop.f32.mrb[18].mxu1  ;;  %955 = vmax.xlane.f32.xlu1 %v954_v11  ;;  %958 = vmax.xlane.f32.xlu0 %v957_v12  ;;  %v632_v14 = vpop.f32.mrb[22].mxu0  ;;  %v1241_v11 = vsel %vm1095_vm3, %v2811_v41, 0 }
 0x2c1   :  { %v2211_v15 = vpop.f32.mrb[19].mxu1  ;;  %v2217_v16 = vpop.f32.mrb[23].mxu0 }
 0x2c6   :  { %v2849_v20 = vpop.f32.mrb[20].mxu1  ;;  %v2851_v21 = vpop.f32.mrb[24].mxu0 }
 0x2c7   :  { %v2222_v22 = vpop.f32.mrb[21].mxu1  ;;  %v2228_v23 = vpop.f32.mrb[25].mxu0  ;;  %v963_v25 = vsel %vm929_vm4, %v2851_v21, -inf }
 0x2c8   :  { %v681_v26 = vpop.f32.mrb[22].mxu1  ;;  %964 = vmax.xlane.f32.xlu0 %v963_v25  ;;  %v730_v27 = vpop.f32.mrb[26].mxu0 }
 0x2c9   :  { %v2223_v28 = vpop.f32.mrb[23].mxu1  ;;  %v2229_v32 = vpop.f32.mrb[27].mxu0 }
 0x2ca   :  { %v932_v34 = vpop.xlane.xlu1 %931 }
 0x2cb   :  { %v978_v35 = vsub.f32 %v2791_v19, %v932_v34 }
 0x2cd   :  { %v994_v36 = vmul.f32 1.442695, %v978_v35 }
 0x2ce   :  { %v2858_v37 = vpop.f32.mrb[24].mxu1  ;;  %v935_v38 = vpop.xlane.xlu0 %934 }
 0x2cf   :  { %2452 = vpow2.f32 %v994_v36  ;;  %v979_v39 = vsub.f32 %v2795_v24, %v935_v38  ;;  %v2861_v45 = vpop.f32.mrb[28].mxu0  ;;  %v2234_v47 = vpop.f32.mrb[25].mxu1 }
 0x2d0   :  { %v2240_v50 = vpop.f32.mrb[29].mxu0  ;;  %v779_v51 = vpop.f32.mrb[26].mxu1  ;;  %v969_v41 = vsel %vm929_vm4, %v2861_v45, -inf }
 0x2d1   :  { %v996_v52 = vmul.f32 1.442695, %v979_v39  ;;  %v828_v53 = vpop.f32.mrb[30].mxu0  ;;  %v2235_v54 = vpop.f32.mrb[27].mxu1  ;;  %1667 = vrot.lane.b32.xlu1 %v2659_v44, %s2552_s25  ;;  %v1193_v44 = vsel %vm1095_vm3, %v2809_v40, 0  ;;  %v960_v40 = vsel %vm929_vm4, %v2849_v20, -inf }
 0x2d2   :  { %v2241_v55 = vpop.f32.mrb[31].mxu0  ;;  %v1337_v51 = vsel %vm1095_vm3, %v2823_v57, 0 }
 0x2d3   :  { %2454 = vpow2.f32 %v996_v52 }
 0x2d6   :  { %v2865_v19 = vpop.f32.mrb[28].mxu1  ;;  %v2867_v60 = vpop.f32.mrb[32].mxu0 }
 0x2d7   :  { %v2246_v61 = vpop.f32.mrb[29].mxu1  ;;  %v2252_v62 = vpop.f32.mrb[33].mxu0  ;;  %v972_v12 = vsel %vm929_vm4, %v2865_v19, -inf  ;;  %v975_v13 = vsel %vm929_vm4, %v2867_v60, -inf }
 0x2d8   :  { %v877_v24 = vpop.f32.mrb[30].mxu1  ;;  %v926_v63 = vpop.f32.mrb[34].mxu0 }
 0x2d9   :  { %v2869_v0 = vpop.eup %2452  ;;  %v2247_v2 = vpop.f32.mrb[31].mxu1 }
 0x2da   :  { %v2253_v3 = vpop.f32.mrb[35].mxu0  ;;  %v1074_v4 = vpack.c.bf16 %v2869_v0, %v2869_v0  ;;  %v1385_v2 = vsel %vm1095_vm3, %v2833_v5, 0 }
 0x2db   :  { %v1433_v3 = vsel %vm1095_vm3, %v2835_v6, 0 }
 0x2dc   :  { %2257 = vmatmul.mubr.msk.bf16.vlgmr.msra.gmra.mrb[32].mxu1 %vm929_vm4, %v1074_v4 }
 0x2dd   :  { %v2876_v9 = vpop.eup %2454  ;;  %2267 = vmatpush3.bf16.msra.mxu1 %v1193_v44  ;;  %2268 = vmatprep.mubr.msk.bf16.mxu1 %vm2543_vm0, %v2542_v1 }
 0x2de   :  { %1715 = vrot.lane.b32.xlu0 %v2661_v46, %s2552_s25  ;;  %v1075_v10 = vpack.c.bf16 %v2876_v9, %v2876_v9  ;;  %2278 = vmatprep.subr.bf16.mxu1 %v2542_v1  ;;  %v966_v46 = vsel %vm929_vm4, %v2858_v37, -inf }
 0x2e0   :  { %2263 = vmatmul.mubr.msk.bf16.vlgmr.msra.gmra.mrb[36].mxu0 %vm929_vm4, %v1075_v10 }
 0x2e1   :  { %2273 = vmatpush3.bf16.msra.mxu0 %v1241_v11  ;;  %2274 = vmatprep.mubr.msk.bf16.mxu0 %vm2543_vm0, %v2542_v1 }
 0x2e2   :  { %2284 = vmatprep.subr.bf16.mxu0 %v2542_v1 }
 0x2f5   :  { %961 = vmax.xlane.f32.xlu1 %v960_v40 }
 0x2f9   :  { %967 = vmax.xlane.f32.xlu1 %v966_v46 }
 0x2fd   :  { %973 = vmax.xlane.f32.xlu1 %v972_v12  ;;  %970 = vmax.xlane.f32.xlu0 %v969_v41  ;;  %v1481_v12 = vsel %vm1095_vm3, %v2845_v17, 0  ;;  %v1529_v41 = vsel %vm1095_vm3, %v2847_v18, 0 }
 0x301   :  { %976 = vmax.xlane.f32.xlu0 %v975_v13 }
 0x30e   :  { %1763 = vrot.lane.b32.xlu1 %v2671_v48, %s2552_s25 }
 0x317   :  { %1811 = vrot.lane.b32.xlu0 %v2673_v49, %s2552_s25 }
 0x335   :  { %v938_v14 = vpop.xlane.xlu0 %937  ;;  %v941_v15 = vpop.xlane.xlu1 %940 }
 0x336   :  { %v980_v16 = vsub.f32 %v2801_v30, %v938_v14  ;;  %v981_v22 = vsub.f32 %v2803_v31, %v941_v15 }
 0x338   :  { %v998_v23 = vmul.f32 1.442695, %v980_v16  ;;  %v1000_v25 = vmul.f32 1.442695, %v981_v22  ;;  %v1577_v22 = vsel %vm1095_vm3, %v2799_v29, 0 }
 0x33a   :  { %2456 = vpow2.f32 %v998_v23  ;;  %v1625_v23 = vsel %vm1095_vm3, %v2855_v33, 0 }
 0x33b   :  { %2458 = vpow2.f32 %v1000_v25 }
 0x33d   :  { %v944_v26 = vpop.xlane.xlu0 %943  ;;  %v947_v27 = vpop.xlane.xlu1 %946 }
 0x33e   :  { %v982_v28 = vsub.f32 %v2813_v42, %v944_v26  ;;  %v983_v32 = vsub.f32 %v2815_v43, %v947_v27  ;;  %v1289_v43 = vsel %vm1095_vm3, %v2821_v56, 0 }
 0x340   :  { %v1002_v48 = vmul.f32 1.442695, %v982_v28  ;;  %v1004_v34 = vmul.f32 1.442695, %v983_v32 }
 0x342   :  { %2460 = vpow2.f32 %v1002_v48 }
 0x343   :  { %2462 = vpow2.f32 %v1004_v34 }
 0x344   :  { %v2457_v49 = vpop.eup %2456 }
 0x345   :  { %v2459_v35 = vpop.eup %2458  ;;  %v950_v36 = vpop.xlane.xlu0 %949  ;;  %v1032_v31 = vsel %vm929_vm4, %v2457_v49, 0.0  ;;  %v1076_v38 = vpack.c.bf16 %v2457_v49, %v2457_v49 }
 0x346   :  { %v953_v30 = vpop.xlane.xlu1 %952  ;;  %v984_v39 = vsub.f32 %v2825_v58, %v950_v36  ;;  %1033 = vadd.xlane.f32.xlu1 %v1032_v31  ;;  %v1035_v42 = vsel %vm929_vm4, %v2459_v35, 0.0  ;;  %v1077_v50 = vpack.c.bf16 %v2459_v35, %v2459_v35 }
 0x347   :  { %v985_v47 = vsub.f32 %v2827_v59, %v953_v30  ;;  %1036 = vadd.xlane.f32.xlu0 %v1035_v42  ;;  %2269 = vmatmul.mubr.msk.bf16.vlgmr.msra.gmra.mrb[36].mxu1 %vm929_vm4, %v1076_v38 }
 0x348   :  { %v1006_v52 = vmul.f32 1.442695, %v984_v39  ;;  %2275 = vmatmul.mubr.msk.bf16.vlgmr.msra.gmra.mrb[40].mxu0 %vm929_vm4, %v1077_v50  ;;  %2279 = vmatpush3.bf16.msra.mxu1 %v1289_v43 }
 0x349   :  { %v1008_v53 = vmul.f32 1.442695, %v985_v47  ;;  %2285 = vmatpush3.bf16.msra.mxu0 %v1337_v51  ;;  %2280 = vmatprep.mubr.msk.bf16.mxu1 %vm2543_vm0, %v2542_v1 }
 0x34a   :  { %2464 = vpow2.f32 %v1006_v52  ;;  %2286 = vmatprep.mubr.msk.bf16.mxu0 %vm2543_vm0, %v2542_v1  ;;  %2290 = vmatprep.subr.bf16.mxu1 %v2542_v1 }
 0x34b   :  { %2466 = vpow2.f32 %v1008_v53  ;;  %2296 = vmatprep.subr.bf16.mxu0 %v2542_v1 }
 0x34c   :  { %v2461_v56 = vpop.eup %2460 }
 0x34d   :  { %v2463_v57 = vpop.eup %2462  ;;  %v956_v58 = vpop.xlane.xlu1 %955  ;;  %v1038_v54 = vsel %vm929_vm4, %v2461_v56, 0.0  ;;  %v1078_v55 = vpack.c.bf16 %v2461_v56, %v2461_v56 }
 0x34e   :  { %v959_v59 = vpop.xlane.xlu0 %958  ;;  %v986_v61 = vsub.f32 %v2837_v7, %v956_v58  ;;  %v1041_v24 = vsel %vm929_vm4, %v2463_v57, 0.0  ;;  %1039 = vadd.xlane.f32.xlu0 %v1038_v54  ;;  %v1079_v63 = vpack.c.bf16 %v2463_v57, %v2463_v57 }
 0x34f   :  { %v987_v62 = vsub.f32 %v2839_v8, %v959_v59  ;;  %1042 = vadd.xlane.f32.xlu1 %v1041_v24  ;;  %2281 = vmatmul.mubr.msk.bf16.vlgmr.msra.gmra.mrb[40].mxu1 %vm929_vm4, %v1078_v55 }
 0x350   :  { %v1010_v4 = vmul.f32 1.442695, %v986_v61  ;;  %2287 = vmatmul.mubr.msk.bf16.vlgmr.msra.gmra.mrb[44].mxu0 %vm929_vm4, %v1079_v63  ;;  %2291 = vmatpush3.bf16.msra.mxu1 %v1385_v2  ;;  %v1026_v2 = vsel %vm929_vm4, %v2869_v0, 0.0 }
 0x351   :  { %v1012_v44 = vmul.f32 1.442695, %v987_v62  ;;  %2297 = vmatpush3.bf16.msra.mxu0 %v1433_v3  ;;  %2292 = vmatprep.mubr.msk.bf16.mxu1 %vm2543_vm0, %v2542_v1  ;;  %v1668_v28 = vpop.permute.xlu1 %1667 }
 0x352   :  { %2468 = vpow2.f32 %v1010_v4  ;;  %2298 = vmatprep.mubr.msk.bf16.mxu0 %vm2543_vm0, %v2542_v1  ;;  %2302 = vmatprep.subr.bf16.mxu1 %v2542_v1  ;;  %v1673_v53 = vsel %vm1095_vm3, %v1668_v28, 0 }
 0x353   :  { %2470 = vpow2.f32 %v1012_v44  ;;  %2308 = vmatprep.subr.bf16.mxu0 %v2542_v1  ;;  %v1029_v44 = vsel %vm929_vm4, %v2876_v9, 0.0  ;;  %v2516_v9 = vld [vmem:[%s3060_s1] sm:$0xff]  }
 0x354   :  { %v2465_v5 = vpop.eup %2464 }
 0x355   :  { %v2467_v6 = vpop.eup %2466  ;;  %v965_v7 = vpop.xlane.xlu0 %964  ;;  %v1044_v8 = vsel %vm929_vm4, %v2465_v5, 0.0  ;;  %v1080_v10 = vpack.c.bf16 %v2465_v5, %v2465_v5 }
 0x356   :  { %v989_v11 = vsub.f32 %v2851_v21, %v965_v7  ;;  %v1047_v40 = vsel %vm929_vm4, %v2467_v6, 0.0  ;;  %1045 = vadd.xlane.f32.xlu0 %v1044_v8  ;;  %v1081_v46 = vpack.c.bf16 %v2467_v6, %v2467_v6 }
 0x357   :  { %1048 = vadd.xlane.f32.xlu1 %v1047_v40  ;;  %2293 = vmatmul.mubr.msk.bf16.vlgmr.msra.gmra.mrb[44].mxu1 %vm929_vm4, %v1080_v10 }
 0x358   :  { %v1016_v13 = vmul.f32 1.442695, %v989_v11  ;;  %2299 = vmatmul.mubr.msk.bf16.vlgmr.msra.gmra.mrb[48].mxu0 %vm929_vm4, %v1081_v46  ;;  %2303 = vmatpush3.bf16.msra.mxu1 %v1481_v12 }
 0x359   :  { %2309 = vmatpush3.bf16.msra.mxu0 %v1529_v41  ;;  %2304 = vmatprep.mubr.msk.bf16.mxu1 %vm2543_vm0, %v2542_v1  ;;  %v1716_v25 = vpop.permute.xlu0 %1715 }
 0x35a   :  { %2472 = vpow2.f32 %v1016_v13  ;;  %2310 = vmatprep.mubr.msk.bf16.mxu0 %vm2543_vm0, %v2542_v1  ;;  %2314 = vmatprep.subr.bf16.mxu1 %v2542_v1  ;;  %v1721_v33 = vsel %vm1095_vm3, %v1716_v25, 0 }
 0x35b   :  { %2320 = vmatprep.subr.bf16.mxu0 %v2542_v1 }
 0x35c   :  { %v2469_v17 = vpop.eup %2468 }
 0x35d   :  { %v2471_v21 = vpop.eup %2470  ;;  %v1050_v18 = vsel %vm929_vm4, %v2469_v17, 0.0  ;;  %v1082_v14 = vpack.c.bf16 %v2469_v17, %v2469_v17 }
 0x35e   :  { %v1053_v15 = vsel %vm929_vm4, %v2471_v21, 0.0  ;;  %1051 = vadd.xlane.f32.xlu0 %v1050_v18  ;;  %v1083_v16 = vpack.c.bf16 %v2471_v21, %v2471_v21 }
 0x35f   :  { %1054 = vadd.xlane.f32.xlu1 %v1053_v15  ;;  %2305 = vmatmul.mubr.msk.bf16.vlgmr.msra.gmra.mrb[48].mxu1 %vm929_vm4, %v1082_v14 }
 0x360   :  { %2311 = vmatmul.mubr.msk.bf16.vlgmr.msra.gmra.mrb[52].mxu0 %vm929_vm4, %v1083_v16  ;;  %2315 = vmatpush3.bf16.msra.mxu1 %v1577_v22 }
 0x361   :  { %2321 = vmatpush3.bf16.msra.mxu0 %v1625_v23  ;;  %2322 = vmatprep.mubr.msk.bf16.mxu0 %vm2543_vm0, %v2542_v1 }
 0x362   :  { %2332 = vmatprep.subr.bf16.mxu0 %v2542_v1  ;;  %2316 = vmatprep.mubr.msk.bf16.mxu1 %vm2543_vm0, %v2542_v1 }
 0x363   :  { %2326 = vmatprep.subr.bf16.mxu1 %v2542_v1 }
 0x364   :  { %v2473_v29 = vpop.eup %2472 }
 0x365   :  { %v1059_v26 = vsel %vm929_vm4, %v2473_v29, 0.0  ;;  %v1085_v27 = vpack.c.bf16 %v2473_v29, %v2473_v29 }
 0x366   :  { %1060 = vadd.xlane.f32.xlu1 %v1059_v26 }
 0x368   :  { %2323 = vmatmul.mubr.msk.bf16.vlgmr.msra.gmra.mrb[56].mxu0 %vm929_vm4, %v1085_v27 }
 0x369   :  { %2333 = vmatpush3.bf16.msra.mxu0 %v1721_v33  ;;  %2334 = vmatprep.mubr.msk.bf16.mxu0 %vm2543_vm0, %v2542_v1 }
 0x36a   :  { %2344 = vmatprep.subr.bf16.mxu0 %v2542_v1 }
 0x382   :  { %v962_v32 = vpop.xlane.xlu1 %961 }
 0x383   :  { %v988_v48 = vsub.f32 %v2849_v20, %v962_v32 }
 0x385   :  { %v1014_v34 = vmul.f32 1.442695, %v988_v48 }
 0x386   :  { %v968_v49 = vpop.xlane.xlu1 %967 }
 0x387   :  { %2474 = vpow2.f32 %v1014_v34  ;;  %v990_v35 = vsub.f32 %v2858_v37, %v968_v49 }
 0x389   :  { %v1018_v36 = vmul.f32 1.442695, %v990_v35 }
 0x38a   :  { %v974_v30 = vpop.xlane.xlu1 %973  ;;  %v971_v31 = vpop.xlane.xlu0 %970 }
 0x38b   :  { %2476 = vpow2.f32 %v1018_v36  ;;  %v992_v38 = vsub.f32 %v2865_v19, %v974_v30  ;;  %v991_v39 = vsub.f32 %v2861_v45, %v971_v31 }
 0x38d   :  { %v1022_v47 = vmul.f32 1.442695, %v992_v38  ;;  %v1020_v42 = vmul.f32 1.442695, %v991_v39 }
 0x38e   :  { %v977_v50 = vpop.xlane.xlu0 %976  ;;  %v1764_v56 = vpop.permute.xlu1 %1763 }
 0x38f   :  { %2478 = vpow2.f32 %v1022_v47  ;;  %v993_v43 = vsub.f32 %v2867_v60, %v977_v50  ;;  %v1769_v62 = vsel %vm1095_vm3, %v1764_v56, 0 }
 0x390   :  { %2480 = vpow2.f32 %v1020_v42 }
 0x391   :  { %v2475_v20 = vpop.eup %2474  ;;  %v1024_v51 = vmul.f32 1.442695, %v993_v43 }
 0x392   :  { %v1056_v52 = vsel %vm929_vm4, %v2475_v20, 0.0  ;;  %v1084_v37 = vpack.c.bf16 %v2475_v20, %v2475_v20  ;;  %v1812_v58 = vpop.permute.xlu0 %1811 }
 0x393   :  { %2482 = vpow2.f32 %v1024_v51  ;;  %1057 = vadd.xlane.f32.xlu0 %v1056_v52  ;;  %v1817_v63 = vsel %vm1095_vm3, %v1812_v58, 0 }
 0x394   :  { %2317 = vmatmul.mubr.msk.bf16.vlgmr.msra.gmra.mrb[52].mxu1 %vm929_vm4, %v1084_v37 }
 0x395   :  { %v2477_v19 = vpop.eup %2476  ;;  %2327 = vmatpush3.bf16.msra.mxu1 %v1673_v53  ;;  %2328 = vmatprep.mubr.msk.bf16.mxu1 %vm2543_vm0, %v2542_v1 }
 0x396   :  { %v1062_v45 = vsel %vm929_vm4, %v2477_v19, 0.0  ;;  %2338 = vmatprep.subr.bf16.mxu1 %v2542_v1  ;;  %v1086_v54 = vpack.c.bf16 %v2477_v19, %v2477_v19 }
 0x397   :  { %1063 = vadd.xlane.f32.xlu0 %v1062_v45 }
 0x399   :  { %v2479_v60 = vpop.eup %2478 }
 0x39a   :  { %v2481_v57 = vpop.eup %2480  ;;  %v1068_v59 = vsel %vm929_vm4, %v2479_v60, 0.0  ;;  %v1088_v4 = vpack.c.bf16 %v2479_v60, %v2479_v60 }
 0x39b   :  { %v1065_v55 = vsel %vm929_vm4, %v2481_v57, 0.0  ;;  %1069 = vadd.xlane.f32.xlu0 %v1068_v59  ;;  %v1087_v61 = vpack.c.bf16 %v2481_v57, %v2481_v57 }
 0x39c   :  { %1066 = vadd.xlane.f32.xlu1 %v1065_v55  ;;  %2329 = vmatmul.mubr.msk.bf16.vlgmr.msra.gmra.mrb[56].mxu1 %vm929_vm4, %v1086_v54 }
 0x39d   :  { %v2483_v24 = vpop.eup %2482  ;;  %2335 = vmatmul.mubr.msk.bf16.vlgmr.msra.gmra.mrb[60].mxu0 %vm929_vm4, %v1087_v61  ;;  %2339 = vmatpush3.bf16.msra.mxu1 %v1769_v62 }
 0x39e   :  { %2345 = vmatpush3.bf16.msra.mxu0 %v1817_v63  ;;  %v1071_v3 = vsel %vm929_vm4, %v2483_v24, 0.0  ;;  %2340 = vmatprep.mubr.msk.bf16.mxu1 %vm2543_vm0, %v2542_v1  ;;  %v1089_v5 = vpack.c.bf16 %v2483_v24, %v2483_v24 }
 0x39f   :  { %1027 = vadd.xlane.f32.xlu0 %v1026_v2  ;;  %2346 = vmatprep.mubr.msk.bf16.mxu0 %vm2543_vm0, %v2542_v1 }
 0x3a0   :  { %1072 = vadd.xlane.f32.xlu1 %v1071_v3  ;;  %2350 = vmatprep.subr.bf16.mxu1 %v2542_v1 }
 0x3a4   :  { %1030 = vadd.xlane.f32.xlu1 %v1029_v44  ;;  %2341 = vmatmul.mubr.msk.bf16.vlgmr.msra.gmra.mrb[60].mxu1 %vm929_vm4, %v1088_v4 }
 0x3a5   :  { %2347 = vmatmul.mubr.msk.bf16.vlgmr.msra.gmra.mrb[64].mxu0 %vm929_vm4, %v1089_v5  ;;  %2354 = vmatprep.mubr.msk.bf16.mxu1 %vm2543_vm0, %v2542_v1 }
 0x3af   :  { %v3008_v0 = vpop.f32.mrb[32].mxu1 }
 0x3b0   :  { %v2258_v6 = vpop.f32.mrb[33].mxu1 }
 0x3b1   :  { %v1136_v7 = vpop.f32.mrb[34].mxu1 }
 0x3b2   :  { %v2259_v8 = vpop.f32.mrb[35].mxu1 }
 0x3b3   :  { %v3010_v10 = vpop.f32.mrb[36].mxu0 }
 0x3b4   :  { %v2264_v11 = vpop.f32.mrb[37].mxu0 }
 0x3b5   :  { %v1184_v40 = vpop.f32.mrb[38].mxu0  ;;  %1974 = vrot.lane.b32.xlu0 %v2516_v9, %s2553_s28 }
 0x3b6   :  { %v2265_v46 = vpop.f32.mrb[39].mxu0 }
 0x3d3   :  { %v1034_v12 = vpop.xlane.xlu1 %1033 }
 0x3d4   :  { %v1037_v41 = vpop.xlane.xlu0 %1036  ;;  %2484 = vrcp.f32 %v1034_v12 }
 0x3d5   :  { %2486 = vrcp.f32 %v1037_v41 }
 0x3db   :  { %v1040_v13 = vpop.xlane.xlu0 %1039 }
 0x3dc   :  { %v1043_v17 = vpop.xlane.xlu1 %1042  ;;  %2488 = vrcp.f32 %v1040_v13 }
 0x3dd   :  { %2490 = vrcp.f32 %v1043_v17 }
 0x3de   :  { %v2485_v18 = vpop.eup %2484 }
 0x3df   :  { %v2487_v16 = vpop.eup %2486 }
 0x3e3   :  { %v1046_v21 = vpop.xlane.xlu0 %1045 }
 0x3e4   :  { %v1049_v32 = vpop.xlane.xlu1 %1048  ;;  %2492 = vrcp.f32 %v1046_v21 }
 0x3e5   :  { %2494 = vrcp.f32 %v1049_v32 }
 0x3e6   :  { %v2489_v35 = vpop.eup %2488 }
 0x3e7   :  { %v2491_v31 = vpop.eup %2490 }
 0x3eb   :  { %v1052_v14 = vpop.xlane.xlu0 %1051 }
 0x3ec   :  { %v1055_v36 = vpop.xlane.xlu1 %1054  ;;  %2496 = vrcp.f32 %v1052_v14 }
 0x3ed   :  { %2498 = vrcp.f32 %v1055_v36 }
 0x3ee   :  { %v2493_v45 = vpop.eup %2492 }
 0x3ef   :  { %v2495_v56 = vpop.eup %2494 }
 0x3f6   :  { %v2497_v44 = vpop.eup %2496 }
 0x3f7   :  { %v2499_v6 = vpop.eup %2498 }
 0x41a   :  { %v1229_v15 = vpop.f32.mrb[36].mxu1 }
 0x41b   :  { %v1877_v22 = vmul.f32 %v2485_v18, %v1229_v15  ;;  %v1277_v23 = vpop.f32.mrb[40].mxu0  ;;  %v2270_v29 = vpop.f32.mrb[37].mxu1 }
 0x41c   :  { %v1878_v25 = vmul.f32 %v2487_v16, %v1277_v23  ;;  %v2276_v26 = vpop.f32.mrb[41].mxu0  ;;  %v1232_v27 = vpop.f32.mrb[38].mxu1 }
 0x41d   :  { %v1280_v33 = vpop.f32.mrb[42].mxu0  ;;  %v2271_v28 = vpop.f32.mrb[39].mxu1 }
 0x41e   :  { %v2414_v48 = vpack.i.bf16 %v1878_v25, %v1877_v22  ;;  %v2277_v34 = vpop.f32.mrb[43].mxu0  ;;  %v1061_v23 = vpop.xlane.xlu1 %1060 }
 0x420   :  { %2415 = vrot.lane.b32.xlu0 %v2414_v48, %s2554_s29  ;;  %v3016_v49 = vpop.xlane.xlu0 %1057 }
 0x422   :  { %v1325_v30 = vpop.f32.mrb[40].mxu1 }
 0x423   :  { %v1879_v38 = vmul.f32 %v2489_v35, %v1325_v30  ;;  %v1373_v39 = vpop.f32.mrb[44].mxu0  ;;  %v2282_v47 = vpop.f32.mrb[41].mxu1 }
 0x424   :  { %v1880_v42 = vmul.f32 %v2491_v31, %v1373_v39  ;;  %v2288_v50 = vpop.f32.mrb[45].mxu0  ;;  %v1328_v43 = vpop.f32.mrb[42].mxu1 }
 0x425   :  { %v1064_v20 = vpop.xlane.xlu0 %1063  ;;  %v1376_v51 = vpop.f32.mrb[46].mxu0 }
 0x426   :  { %v2419_v52 = vpack.i.bf16 %v1880_v42, %v1879_v38  ;;  %v2283_v37 = vpop.f32.mrb[43].mxu1  ;;  %v2289_v53 = vpop.f32.mrb[47].mxu0 }
 0x428   :  { %2420 = vrot.lane.b32.xlu1 %v2419_v52, %s2555_s30 }
 0x429   :  { %v1070_v19 = vpop.xlane.xlu0 %1069 }
 0x42a   :  { %v1421_v60 = vpop.f32.mrb[44].mxu1 }
 0x42b   :  { %v1881_v57 = vmul.f32 %v2493_v45, %v1421_v60  ;;  %v1469_v58 = vpop.f32.mrb[48].mxu0  ;;  %v2294_v59 = vpop.f32.mrb[45].mxu1 }
 0x42c   :  { %v1882_v54 = vmul.f32 %v2495_v56, %v1469_v58  ;;  %v2300_v55 = vpop.f32.mrb[49].mxu0  ;;  %v1424_v61 = vpop.f32.mrb[46].mxu1  ;;  %v2517_v59 = vld [vmem:[%s3060_s1 + $0x8] sm:$0xff]  }
 0x42d   :  { %v1028_v62 = vpop.xlane.xlu0 %1027  ;;  %v1472_v63 = vpop.f32.mrb[50].mxu0 }
 0x42e   :  { %v2424_v24 = vpack.i.bf16 %v1882_v54, %v1881_v57  ;;  %v2295_v2 = vpop.f32.mrb[47].mxu1  ;;  %2500 = vrcp.f32 %v1028_v62  ;;  %v2301_v3 = vpop.f32.mrb[51].mxu0 }
 0x42f   :  { %2502 = vrcp.f32 %v1061_v23 }
 0x430   :  { %2425 = vrot.lane.b32.xlu1 %v2424_v24, %s2556_s4  ;;  %2504 = vrcp.f32 %v3016_v49 }
 0x431   :  { %v1975_v4 = vpop.permute.xlu0 %1974  ;;  %2506 = vrcp.f32 %v1064_v20 }
 0x432   :  { %v1517_v5 = vpop.f32.mrb[48].mxu1  ;;  %2351 = vmatpush3.bf16.msra.mxu1 %v1975_v4 }
 0x433   :  { %v1883_v7 = vmul.f32 %v2497_v44, %v1517_v5  ;;  %v1565_v8 = vpop.f32.mrb[52].mxu0  ;;  %v2306_v11 = vpop.f32.mrb[49].mxu1  ;;  %2352 = vmatprep.subr.bf16.mxu1 %v2542_v1 }
 0x434   :  { %v1884_v40 = vmul.f32 %v2499_v6, %v1565_v8  ;;  %v2312_v9 = vpop.f32.mrb[53].mxu0  ;;  %v1520_v46 = vpop.f32.mrb[50].mxu1 }
 0x435   :  { %v1568_v12 = vpop.f32.mrb[54].mxu0  ;;  %v2307_v41 = vpop.f32.mrb[51].mxu1 }
 0x436   :  { %v2429_v13 = vpack.i.bf16 %v1884_v40, %v1883_v7  ;;  %v2313_v17 = vpop.f32.mrb[55].mxu0  ;;  %v1067_v1 = vpop.xlane.xlu1 %1066 }
 0x437   :  { %2508 = vrcp.f32 %v1067_v1 }
 0x438   :  { %2430 = vrot.lane.b32.xlu1 %v2429_v13, %s2557_s5  ;;  %v2501_v21 = vpop.eup %2500  ;;  %2510 = vrcp.f32 %v1070_v19 }
 0x439   :  { %v3021_v18 = vmul.f32 %v2501_v21, %v3008_v0  ;;  %v2503_v29 = vpop.eup %2502 }
 0x43a   :  { %v2505_v25 = vpop.eup %2504  ;;  %v1073_v34 = vpop.xlane.xlu1 %1072 }
 0x43b   :  { %v1661_v14 = vpop.f32.mrb[56].mxu0  ;;  %2512 = vrcp.f32 %v1073_v34  ;;  %v2507_v35 = vpop.eup %2506 }
 0x43c   :  { %v2324_v15 = vpop.f32.mrb[57].mxu0  ;;  %v1886_v27 = vmul.f32 %v2503_v29, %v1661_v14 }
 0x43d   :  { %v1664_v16 = vpop.f32.mrb[58].mxu0 }
 0x43e   :  { %v2325_v22 = vpop.f32.mrb[59].mxu0  ;;  %v1031_v24 = vpop.xlane.xlu1 %1030 }
 0x43f   :  { %2514 = vrcp.f32 %v1031_v24 }
 0x441   :  { %v2509_v49 = vpop.eup %2508 }
 0x442   :  { %v2511_v52 = vpop.eup %2510 }
 0x445   :  { %v2513_v53 = vpop.eup %2512 }
 0x449   :  { %v2515_v44 = vpop.eup %2514 }
 0x44a   :  { %v1876_v9 = vmul.f32 %v2515_v44, %v3010_v10 }
 0x467   :  { %v1613_v26 = vpop.f32.mrb[52].mxu1 }
 0x468   :  { %v1885_v33 = vmul.f32 %v2505_v25, %v1613_v26  ;;  %v2318_v28 = vpop.f32.mrb[53].mxu1 }
 0x469   :  { %v1616_v32 = vpop.f32.mrb[54].mxu1 }
 0x46a   :  { %v2434_v0 = vpack.i.bf16 %v1886_v27, %v1885_v33  ;;  %v2319_v48 = vpop.f32.mrb[55].mxu1 }
 0x46c   :  { %2435 = vrot.lane.b32.xlu0 %v2434_v0, %s2558_s6 }
 0x46f   :  { %v1709_v36 = vpop.f32.mrb[56].mxu1 }
 0x470   :  { %v1887_v30 = vmul.f32 %v2507_v35, %v1709_v36  ;;  %v1757_v31 = vpop.f32.mrb[60].mxu0  ;;  %v2330_v38 = vpop.f32.mrb[57].mxu1 }
 0x471   :  { %v1888_v39 = vmul.f32 %v2509_v49, %v1757_v31  ;;  %v2336_v47 = vpop.f32.mrb[61].mxu0  ;;  %v1712_v42 = vpop.f32.mrb[58].mxu1 }
 0x472   :  { %v1760_v50 = vpop.f32.mrb[62].mxu0  ;;  %v2331_v43 = vpop.f32.mrb[59].mxu1 }
 0x473   :  { %v2439_v20 = vpack.i.bf16 %v1888_v39, %v1887_v30  ;;  %v2337_v51 = vpop.f32.mrb[63].mxu0  ;;  %v2078_v30 = vld [vmem:[%s3061_s2] ss:$0 sm:$0xff] }
 0x475   :  { %2440 = vrot.lane.b32.xlu1 %v2439_v20, %s2559_s7 }
 0x477   :  { %v1805_v37 = vpop.f32.mrb[60].mxu1 }
 0x478   :  { %v1889_v19 = vmul.f32 %v2511_v52, %v1805_v37  ;;  %v1853_v45 = vpop.f32.mrb[64].mxu0  ;;  %v2342_v60 = vpop.f32.mrb[61].mxu1 }
 0x479   :  { %v1890_v56 = vmul.f32 %v2513_v53, %v1853_v45  ;;  %v2348_v57 = vpop.f32.mrb[65].mxu0  ;;  %v1808_v58 = vpop.f32.mrb[62].mxu1  ;;  %1976 = vrot.lane.b32.xlu1 %v2517_v59, %s2553_s28 }
 0x47a   :  { %v1856_v54 = vpop.f32.mrb[66].mxu0  ;;  %v2343_v55 = vpop.f32.mrb[63].mxu1 }
 0x47b   :  { %v2444_v61 = vpack.i.bf16 %v1890_v56, %v1889_v19  ;;  %v2349_v62 = vpop.f32.mrb[67].mxu0 }
 0x47d   :  { %2445 = vrot.lane.b32.xlu0 %v2444_v61, %s2560_s10 }
 0x492   :  { %v2416_v4 = vpop.permute.xlu0 %2415 }
 0x493   :  { %v2418_v6 = vunpack.i.h.bf16 %v2416_v4  ;;  %v2417_v7 = vunpack.i.l.bf16 %v2416_v4 }
 0x495   :  { %v1948_v21 = vsel %vm147_vm2, %v1876_v9, %v2418_v6  ;;  %v1947_v14 = vsel %vm147_vm2, %v3021_v18, %v2417_v7 }
 0x49a   :  { %v2421_v63 = vpop.permute.xlu1 %2420 }
 0x49b   :  { %v2423_v8 = vunpack.i.h.bf16 %v2421_v63  ;;  %v2422_v11 = vunpack.i.l.bf16 %v2421_v63 }
 0x49d   :  { %v1950_v22 = vsel %vm929_vm4, %v1948_v21, %v2423_v8  ;;  %v1949_v10 = vsel %vm929_vm4, %v1947_v14, %v2422_v11 }
 0x4a2   :  { %v2426_v2 = vpop.permute.xlu1 %2425 }
 0x4a3   :  { %v2428_v46 = vunpack.i.h.bf16 %v2426_v2  ;;  %v2427_v12 = vunpack.i.l.bf16 %v2426_v2 }
 0x4a5   :  { %v1953_v29 = vsel %vm1951_vm5, %v1950_v22, %v2428_v46  ;;  %v1952_v25 = vsel %vm1951_vm5, %v1949_v10, %v2427_v12 }
 0x4aa   :  { %v2431_v3 = vpop.permute.xlu1 %2430 }
 0x4ab   :  { %v2433_v41 = vunpack.i.h.bf16 %v2431_v3  ;;  %v2432_v13 = vunpack.i.l.bf16 %v2431_v3 }
 0x4ad   :  { %v1956_v26 = vsel %vm1954_vm6, %v1953_v29, %v2433_v41  ;;  %v1955_v27 = vsel %vm1954_vm6, %v1952_v25, %v2432_v13 }
 0x4de   :  { %v2436_v40 = vpop.permute.xlu0 %2435 }
 0x4df   :  { %v2438_v15 = vunpack.i.h.bf16 %v2436_v40  ;;  %v2437_v16 = vunpack.i.l.bf16 %v2436_v40 }
 0x4e1   :  { %v1959_v33 = vsel %vm1957_vm7, %v1956_v26, %v2438_v15  ;;  %v1958_v28 = vsel %vm1957_vm7, %v1955_v27, %v2437_v16 }
 0x4e7   :  { %v2441_v5 = vpop.permute.xlu1 %2440 }
 0x4e8   :  { %v2443_v23 = vunpack.i.h.bf16 %v2441_v5  ;;  %v2442_v1 = vunpack.i.l.bf16 %v2441_v5 }
 0x4ea   :  { %v1962_v48 = vsel %vm1960_vm8, %v1959_v33, %v2443_v23  ;;  %v1961_v34 = vsel %vm1960_vm8, %v1958_v28, %v2442_v1 }
 0x4eb   :  { %v1977_v17 = vpop.permute.xlu1 %1976 }
 0x4ec   :  { %2353 = vmatpush3.bf16.msra.mxu1 %v1977_v17 }
 0x4ef   :  { %v2446_v18 = vpop.permute.xlu0 %2445 }
 0x4f0   :  { %v2448_v32 = vunpack.i.h.bf16 %v2446_v18  ;;  %v2447_v0 = vunpack.i.l.bf16 %v2446_v18 }
 0x4f2   :  { %v1965_v35 = vsel %vm1963_vm9, %v1962_v48, %v2448_v32  ;;  %v1964_v36 = vsel %vm1963_vm9, %v1961_v34, %v2447_v0 }
 0x4f3   :  { %v1966_v49 = vpack.c.bf16 %v1965_v35, %v1964_v36 }
 0x4f5   :  { %2355 = vmatmul.mubr.msk.bf16.vlgmr.msra.gmra.mrb[64].mxu1 %vm39_vm1, %v1966_v49 }
 0x5c8   :  { %v2017_v31 = vpop.f32.mrb[64].mxu1 }
 0x5c9   :  { %v2018_v38 = vadd.f32 %v2078_v30, %v2017_v31  ;;  %v2356_v39 = vpop.f32.mrb[65].mxu1 }
 0x5ca   :  { %v2020_v47 = vpop.f32.mrb[66].mxu1 }
 0x5cb   :  { %2024 = vst.msk [vmem:[#allocation2] sm:$0xff] %vm39_vm1, %v2018_v38  ;;  %v2021_v42 = vadd.f32 %v2078_v30, %v2020_v47  ;;  %v2357_v50 = vpop.f32.mrb[67].mxu1 }
 0x5cd   :  { %2025 = vst.msk [vmem:[#allocation2 + $0x8] sm:$0xff] %vm39_vm1, %v2021_v42 }
 0x5ce   :  { %2529 = shalt.err (!%p2526_p4)
}
 0x5cf   :  { %s2530_s16 = scalar_lea.hbm %s3062_s3, 256 }
 0x5d0   :  { %p2531_p5 = scmp.ne.s32.totalorder %s3062_s3, %s2530_s16  ;;  %p2534_p6 = scmp.lt.u32.totalorder %s2530_s16, %s3062_s3 }
 0x5d2   :  { %p2536_p7 = pnand %p2534_p6, %p2531_p5 }
 0x5d4   :  { %2539 = shalt.err (!%p2536_p7)
}
 0x5d5   :  { %s2562_s0 = smov 128  }
 0x5d6   :  { %2037 = dma.vmem_to_hbm [thread:$0]  %s2032_s13, 256, %s3062_s3, [#allocation3], %s2562_s0, %s2562_s0, %s2555_s30  }
 0x5d7   :  { %2540 = dma.done.wait [#allocation3], 256  }
 0x5d8   :  { %2541 = vsyncadd [#allocation3], 4294967040 }
 0x5d9   :  { %2041 = vsyncpa [#allocation3], 1 }

</bundles_post_ra>
